<compile_context>
chip_gen: v7x
topology: tpu7x:2x2x1
jax: 0.10.0
libtpu: 0.0.40
codegen_flags: <defaults>
</compile_context>

<pallas_src>
import functools

import jax
import jax.numpy as jnp
from jax.experimental import pallas as pl
from jax.experimental.pallas import tpu as pltpu


def _round_up(a, b):
    return ((a + b - 1) // b) * b


# Per-buffer block target.  1-2 MiB already reaches ~85% of HBM roofline and
# keeps the folded path's f32 temporaries (~6-7 block-sized live values) plus
# the double-buffered I/O well under v7x's 64 MiB VMEM.
_TARGET_BLOCK_BYTES = 2 * 1024 * 1024


def _vmem_limit_bytes():
    """Generation-aware scoped-VMEM cap: 48 MiB on 128 MiB parts, 32 MiB on v7x."""
    cap = 128 * 1024 * 1024
    try:
        info = pltpu.get_tpu_info()
        cap = int(getattr(info, "vmem_capacity_bytes", cap))
    except Exception:
        pass  # no TPU visible (e.g. interpret mode) -> conservative default
    return min(cap // 2, 48 * 1024 * 1024)


def _layernorm_kernel(x_ref, ab_ref, *rest, d, k, eps):
    if k > 1:
        g_ref, o_ref = rest
    else:
        (o_ref,) = rest

    x = x_ref[...].astype(jnp.float32)          # [block_rows, lane_w]
    ab = ab_ref[...].astype(jnp.float32)        # [2, lane_w] resident alpha/beta
    alpha = ab[0:1, :]
    beta = ab[1:2, :]

    if k > 1:
        # Folded path: each 128-wide row holds k tokens of d features.  Grouped
        # sum (broadcast back to every lane of the group) via a resident
        # block-diagonal 0/1 matrix on the idle MXU.  The f32 operand is split
        # hi/lo into two bf16 passes -> ~1e-5 relative accuracy independent of
        # the MXU's default f32 precision (and of interpret mode).
        g = g_ref[...]                           # [lane_w, lane_w] bf16, 0/1

        def grouped_sum(v):
            vh = v.astype(jnp.bfloat16)
            vl = (v - vh.astype(jnp.float32)).astype(jnp.bfloat16)
            return (jnp.dot(vh, g, preferred_element_type=jnp.float32)
                    + jnp.dot(vl, g, preferred_element_type=jnp.float32))

        s = grouped_sum(x)
        sq = grouped_sum(x * x)
    else:
        # Lane-dense path (last dim is a full multiple of 128): XLU reductions.
        # Zero-padded features (if any) contribute 0 to both sums.
        s = jnp.sum(x, axis=-1, keepdims=True)
        sq = jnp.sum(x * x, axis=-1, keepdims=True)

    mean = s / d
    # Fused one-pass unbiased variance: (sumsq - mean*sum) / (d - 1).
    # (d == 1 yields 0/0 = NaN, matching torch.std's unbiased estimator.)
    var = jnp.maximum(sq - mean * s, 0.0) / (d - 1)
    std = jnp.sqrt(var)
    # Exact divide (not approx reciprocal) for parity with the reference.
    y = alpha * (x - mean) / (std + eps) + beta
    o_ref[...] = y.astype(o_ref.dtype)


def layer_norm(x, alpha, beta, *, eps=1e-6):
    """Pallas LayerNorm matching the reference module's math (unbiased std)."""
    orig_shape = x.shape
    d = orig_shape[-1]
    x2 = x.reshape(-1, d)
    rows = x2.shape[0]
    itemsize = jnp.dtype(x.dtype).itemsize

    # Layout decision: fold small divisors of 128; otherwise pad the feature
    # dim up to a multiple of 128 so stores stay lane-dense.
    if d < 128 and 128 % d == 0:
        k = 128 // d
        d_pad = d
    else:
        k = 1
        d_pad = _round_up(d, 128)
    lane_w = k * d_pad

    alpha_f = alpha.astype(jnp.float32).reshape(-1)
    beta_f = beta.astype(jnp.float32).reshape(-1)
    if d_pad != d:
        # Zero-padded features: 0 contribution to sum/sumsq; alpha pad = 0
        # makes the padded outputs exactly 0 (finite), sliced off below.
        alpha_f = jnp.pad(alpha_f, (0, d_pad - d))
        beta_f = jnp.pad(beta_f, (0, d_pad - d))
        x2 = jnp.pad(x2, ((0, 0), (0, d_pad - d)))

    # Pad the row count only to a multiple of the fold factor (<= k-1 rows);
    # Pallas masks the ragged last block, so no block-multiple padding pass.
    rows_p = _round_up(rows, k)
    if rows_p != rows:
        x2 = jnp.pad(x2, ((0, rows_p - rows), (0, 0)))

    folded_rows = rows_p // k
    xf = x2.reshape(folded_rows, lane_w)

    # Pack (tiled) alpha/beta into one resident [2, lane_w] operand.
    ab = jnp.stack([jnp.tile(alpha_f, k), jnp.tile(beta_f, k)], axis=0)

    # Block rows: ~_TARGET_BLOCK_BYTES per buffer, multiple of 8 sublanes, and
    # >= 2 grid steps whenever folded_rows > 8 (v7x dual TensorCores).
    target_rows = max(8, (_TARGET_BLOCK_BYTES // (lane_w * itemsize)) // 8 * 8)
    if folded_rows <= 8:
        block_rows = folded_rows                 # single block == full array
    else:
        block_rows = min(target_rows, _round_up(pl.cdiv(folded_rows, 2), 8))
    grid = (pl.cdiv(folded_rows, block_rows),)

    in_specs = [
        pl.BlockSpec((block_rows, lane_w), lambda i: (i, 0)),
        pl.BlockSpec((2, lane_w), lambda i: (0, 0)),
    ]
    operands = [xf, ab]
    if k > 1:
        # Hoisted block-diagonal 0/1 group matrix (DMA'd once, stays resident).
        gmat = jnp.kron(jnp.eye(k, dtype=jnp.float32),
                        jnp.ones((d_pad, d_pad), jnp.float32)).astype(jnp.bfloat16)
        in_specs.append(pl.BlockSpec((lane_w, lane_w), lambda i: (0, 0)))
        operands.append(gmat)

    # Advisory cost: folded path includes the four [rows,128]x[128,128] matmuls.
    flops_per_row = (8 * lane_w * lane_w if k > 1 else 0) + 12 * lane_w
    out = pl.pallas_call(
        functools.partial(_layernorm_kernel, d=d, k=k, eps=eps),
        out_shape=jax.ShapeDtypeStruct(xf.shape, x.dtype),
        grid_spec=pltpu.PrefetchScalarGridSpec(
            num_scalar_prefetch=0,
            grid=grid,
            in_specs=in_specs,
            out_specs=pl.BlockSpec((block_rows, lane_w), lambda i: (i, 0)),
        ),
        compiler_params=pltpu.CompilerParams(
            dimension_semantics=("parallel",),
            vmem_limit_bytes=_vmem_limit_bytes(),
        ),
        cost_estimate=pl.CostEstimate(
            flops=folded_rows * flops_per_row,
            transcendentals=2 * rows_p,
            bytes_accessed=2 * folded_rows * lane_w * itemsize,
        ),
    )(*operands)

    out = out.reshape(rows_p, d_pad)
    if rows_p != rows:
        out = out[:rows]
    if d_pad != d:
        out = out[:, :d]
    return out.reshape(orig_shape)


class Encoder:
    """Stack of encoder layers followed by a final LayerNorm (Pallas kernel)."""

    def __init__(self, layers, size, eps=1e-6):
        # TODO(synk): the reference's `layer` submodule is an injected dependency
        # whose class is not defined in the spec; the stack is therefore taken
        # as caller-provided callables with signature layer(x, mask) -> x.
        self.layers = list(layers)
        # LayerNorm params, initialized exactly like the reference module.
        self.alpha = jnp.ones((size,), jnp.float32)
        self.beta = jnp.zeros((size,), jnp.float32)
        self.eps = eps

    def __call__(self, x, mask):
        for layer in self.layers:
            x = layer(x, mask)
        return layer_norm(x, self.alpha, self.beta, eps=self.eps)


def _ref_layernorm(x, alpha, beta, eps):
    d = x.shape[-1]
    mean = x.mean(-1, keepdims=True)
    std = jnp.sqrt(jnp.sum((x - mean) ** 2, axis=-1, keepdims=True) / (d - 1))
    return alpha * (x - mean) / (std + eps) + beta


if __name__ == "__main__":
    key = jax.random.PRNGKey(0)
    B, S, D = 2, 8, 32
    N = 2

    x = jax.random.normal(key, (B, S, D), dtype=jnp.float32)
    mask = jnp.ones((B, 1, S), dtype=jnp.float32)

    # Identity stand-in layers (the layer class is not defined in the reference).
    layers = [(lambda x, mask: x) for _ in range(N)]
    enc = Encoder(layers, size=D)

    out = jax.block_until_ready(enc(x, mask))
    ref = _ref_layernorm(x, enc.alpha, enc.beta, enc.eps)
    assert out.shape == (B, S, D)
    assert jnp.allclose(out, ref, atol=1e-4, rtol=1e-4), "kernel/reference mismatch"

    # Lane-dense (D multiple of 128) path with a multi-block grid.
    D2 = 128
    x2 = jax.random.normal(jax.random.PRNGKey(1), (4, 8, D2), dtype=jnp.float32)
    a2 = jnp.ones((D2,), jnp.float32)
    b2 = jnp.zeros((D2,), jnp.float32)
    out2 = jax.block_until_ready(layer_norm(x2, a2, b2))
    ref2 = _ref_layernorm(x2, a2, b2, 1e-6)
    assert jnp.allclose(out2, ref2, atol=1e-4, rtol=1e-4), "wide-D path mismatch"

    # Awkward D (feature-padded to 128) path.
    D3 = 96
    x3 = jax.random.normal(jax.random.PRNGKey(2), (2, 8, D3), dtype=jnp.float32)
    a3 = jax.random.normal(jax.random.PRNGKey(3), (D3,), dtype=jnp.float32)
    b3 = jax.random.normal(jax.random.PRNGKey(4), (D3,), dtype=jnp.float32)
    out3 = jax.block_until_ready(layer_norm(x3, a3, b3))
    ref3 = _ref_layernorm(x3, a3, b3, 1e-6)
    assert jnp.allclose(out3, ref3, atol=1e-4, rtol=1e-4), "padded-D path mismatch"

    print("KERNEL_OK")
</pallas_src>

<mosaic_0001>
module attributes {stable_mosaic.version = 11 : i64} {
  func.func @_layernorm_kernel(%arg0: i32, %arg1: memref<4x128xf32, #tpu.memory_space<vmem>>, %arg2: memref<2x128xf32, #tpu.memory_space<vmem>>, %arg3: memref<128x128xbf16, #tpu.memory_space<vmem>>, %arg4: memref<4x128xf32, #tpu.memory_space<vmem>>) attributes {dimension_semantics = [#tpu.dimension_semantics<parallel>], iteration_bounds = array<i64: 1>, scalar_prefetch = 0 : i64, scratch_operands = 0 : i64, tpu.core_type = #tpu.core_type<tc>, window_params = [{transform_indices = @transform_0, window_bounds = array<i64: 4, 128>}, {pipeline_mode = #tpu.pipeline_mode<synchronous>, transform_indices = @transform_1, window_bounds = array<i64: 2, 128>}, {pipeline_mode = #tpu.pipeline_mode<synchronous>, transform_indices = @transform_2, window_bounds = array<i64: 128, 128>}, {transform_indices = @transform_3, window_bounds = array<i64: 4, 128>}]} {
    %c0 = arith.constant 0 : index
    %c0_0 = arith.constant 0 : index
    %0 = vector.load %arg1[%c0, %c0_0] : memref<4x128xf32, #tpu.memory_space<vmem>>, vector<4x128xf32>
    %c0_1 = arith.constant 0 : index
    %c0_2 = arith.constant 0 : index
    %1 = vector.load %arg2[%c0_1, %c0_2] : memref<2x128xf32, #tpu.memory_space<vmem>>, vector<2x128xf32>
    %2 = vector.extract_strided_slice %1 {offsets = [0, 0], sizes = [1, 128], strides = [1, 1]} : vector<2x128xf32> to vector<1x128xf32>
    %3 = vector.extract_strided_slice %1 {offsets = [1, 0], sizes = [1, 128], strides = [1, 1]} : vector<2x128xf32> to vector<1x128xf32>
    %c0_3 = arith.constant 0 : index
    %c0_4 = arith.constant 0 : index
    %4 = vector.load %arg3[%c0_3, %c0_4] : memref<128x128xbf16, #tpu.memory_space<vmem>>, vector<128x128xbf16>
    %5 = arith.truncf %0 : vector<4x128xf32> to vector<4x128xbf16>
    %6 = arith.extf %5 : vector<4x128xbf16> to vector<4x128xf32>
    %7 = arith.subf %0, %6 : vector<4x128xf32>
    %8 = arith.truncf %7 : vector<4x128xf32> to vector<4x128xbf16>
    %cst = arith.constant dense<0.000000e+00> : vector<4x128xf32>
    %9 = tpu.matmul %5, %4, %cst {dimension_numbers = #tpu.dot_dimension_numbers<[1], [0], [0], [1], [0, 0, 1, 1], [], []>} : vector<4x128xbf16>, vector<128x128xbf16>, vector<4x128xf32> -> vector<4x128xf32>
    %cst_5 = arith.constant dense<0.000000e+00> : vector<4x128xf32>
    %10 = tpu.matmul %8, %4, %cst_5 {dimension_numbers = #tpu.dot_dimension_numbers<[1], [0], [0], [1], [0, 0, 1, 1], [], []>} : vector<4x128xbf16>, vector<128x128xbf16>, vector<4x128xf32> -> vector<4x128xf32>
    %11 = arith.addf %9, %10 : vector<4x128xf32>
    %12 = arith.mulf %0, %0 : vector<4x128xf32>
    %13 = arith.truncf %12 : vector<4x128xf32> to vector<4x128xbf16>
    %14 = arith.extf %13 : vector<4x128xbf16> to vector<4x128xf32>
    %15 = arith.subf %12, %14 : vector<4x128xf32>
    %16 = arith.truncf %15 : vector<4x128xf32> to vector<4x128xbf16>
    %cst_6 = arith.constant dense<0.000000e+00> : vector<4x128xf32>
    %17 = tpu.matmul %13, %4, %cst_6 {dimension_numbers = #tpu.dot_dimension_numbers<[1], [0], [0], [1], [0, 0, 1, 1], [], []>} : vector<4x128xbf16>, vector<128x128xbf16>, vector<4x128xf32> -> vector<4x128xf32>
    %cst_7 = arith.constant dense<0.000000e+00> : vector<4x128xf32>
    %18 = tpu.matmul %16, %4, %cst_7 {dimension_numbers = #tpu.dot_dimension_numbers<[1], [0], [0], [1], [0, 0, 1, 1], [], []>} : vector<4x128xbf16>, vector<128x128xbf16>, vector<4x128xf32> -> vector<4x128xf32>
    %19 = arith.addf %17, %18 : vector<4x128xf32>
    %cst_8 = arith.constant 3.200000e+01 : f32
    %20 = vector.broadcast %cst_8 : f32 to vector<4x128xf32>
    %21 = arith.divf %11, %20 : vector<4x128xf32>
    %22 = arith.mulf %21, %11 : vector<4x128xf32>
    %23 = arith.subf %19, %22 : vector<4x128xf32>
    %cst_9 = arith.constant 0.000000e+00 : f32
    %24 = vector.broadcast %cst_9 : f32 to vector<4x128xf32>
    %25 = arith.maximumf %23, %24 : vector<4x128xf32>
    %cst_10 = arith.constant 3.100000e+01 : f32
    %26 = vector.broadcast %cst_10 : f32 to vector<4x128xf32>
    %27 = arith.divf %25, %26 : vector<4x128xf32>
    %28 = math.sqrt %27 : vector<4x128xf32>
    %29 = arith.subf %0, %21 : vector<4x128xf32>
    %30 = vector.broadcast %2 : vector<1x128xf32> to vector<4x128xf32>
    %31 = arith.mulf %30, %29 : vector<4x128xf32>
    %cst_11 = arith.constant 9.99999997E-7 : f32
    %32 = vector.broadcast %cst_11 : f32 to vector<4x128xf32>
    %33 = arith.addf %28, %32 : vector<4x128xf32>
    %34 = arith.divf %31, %33 : vector<4x128xf32>
    %35 = vector.broadcast %3 : vector<1x128xf32> to vector<4x128xf32>
    %36 = arith.addf %34, %35 : vector<4x128xf32>
    %c0_12 = arith.constant 0 : index
    %c0_13 = arith.constant 0 : index
    %37 = vector.load %arg4[%c0_12, %c0_13] : memref<4x128xf32, #tpu.memory_space<vmem>>, vector<4x128xf32>
    tpu.vector_store %arg4[%c0_12, %c0_13], %36 {strides = array<i32>} : memref<4x128xf32, #tpu.memory_space<vmem>>, vector<4x128xf32>,
    return
  }
  func.func @transform_0(%arg0: i32) -> (i32, i32) {
    %c0_i32 = arith.constant 0 : i32
    %c0_i32_0 = arith.constant 0 : i32
    return %arg0, %c0_i32 : i32, i32
  }
  func.func @transform_1(%arg0: i32) -> (i32, i32) {
    %c0_i32 = arith.constant 0 : i32
    %c0_i32_0 = arith.constant 0 : i32
    %c0_i32_1 = arith.constant 0 : i32
    return %c0_i32, %c0_i32_0 : i32, i32
  }
  func.func @transform_2(%arg0: i32) -> (i32, i32) {
    %c0_i32 = arith.constant 0 : i32
    %c0_i32_0 = arith.constant 0 : i32
    %c0_i32_1 = arith.constant 0 : i32
    return %c0_i32, %c0_i32_0 : i32, i32
  }
  func.func @transform_3(%arg0: i32) -> (i32, i32) {
    %c0_i32 = arith.constant 0 : i32
    %c0_i32_0 = arith.constant 0 : i32
    return %arg0, %c0_i32 : i32, i32
  }
}

</mosaic_0001>

<bundles_post_ra>
// kernel: tpu_custom_call.1
= control target key start
LH: loop header
LB: loop body
LE: loop exit
PB: predicated region body
PF: predicated region fallthrough
CT: control target
= control target key end

     0   :  { %8 = vsyncpa [#allocation3], 0  ;;  %s666_s0 = inlined_call_operand.hbm [shape: f32[4,128], index: 0, kind: input, shape index: {}]   ;;  %s667_s1 = inlined_call_operand.vmem [shape: f32[2,128], index: 1, kind: input, shape index: {}]   ;;  %s668_s2 = inlined_call_operand.hbm [shape: bf16[128,128], index: 2, kind: input, shape index: {}]   ;;  %s669_s3 = inlined_call_operand.hbm [shape: f32[4,128], index: 3, kind: output, shape index: {}]  }
   0x1   :  { %9 = vsyncpa [#allocation6], 0 }
   0x2   :  { %10 = vsyncpa [#allocation4], 0  ;;  %s545_s12 = smov [#allocation2]   ;;  %s546_s14 = smov [#allocation5]  }
   0x3   :  { %s17_s13 = sshll.u32 %s545_s12, 4  ;;  %s28_s15 = sshll.u32 %s546_s14, 4  ;;  %s18_s13 = int_to_ptr.vmem [resolvable:$true] %s17_s13  ;;  %s572_s15 = int_to_ptr.vmem [resolvable:$true] %s28_s15 }
   0x4   :  { %s473_s18 = scalar_lea.hbm %s666_s0, 64 }
   0x5   :  { %p474_p0 = scmp.ne.s32.totalorder %s666_s0, %s473_s18  ;;  %p477_p1 = scmp.lt.u32.totalorder %s473_s18, %s666_s0 }
   0x7   :  { %p479_p2 = pnand %p477_p1, %p474_p0 }
   0x9   :  { %482 = shalt.err (!%p479_p2)
}
   0xa   :  { %s483_s23 = scalar_lea.vmem %s18_s13, 64  ;;  %p488_p4 = scmp.lt.s32.totalorder %s18_s13, %s18_s13 }
   0xb   :  { %p484_p3 = scmp.ne.s32.totalorder %s18_s13, %s483_s23  ;;  %p489_p5 = scmp.lt.s32.totalorder %s483_s23, %s483_s23 }
   0xd   :  { %p490_p6 = por %p489_p5, %p488_p4 }
   0xf   :  { %p491_p7 = pnand %p490_p6, %p484_p3 }
  0x11   :  { %494 = shalt.err (!%p491_p7)
}
  0x12   :  { %20 = dma.hbm_to_vmem [thread:$0]  %s666_s0, 64, %s18_s13, [#allocation3]  }
  0x13   :  { %s495_s28 = scalar_lea.hbm %s668_s2, 1024 }
  0x14   :  { %p496_p8 = scmp.ne.s32.totalorder %s668_s2, %s495_s28  ;;  %p499_p9 = scmp.lt.u32.totalorder %s495_s28, %s668_s2 }
  0x16   :  { %p501_p10 = pnand %p499_p9, %p496_p8 }
  0x18   :  { %504 = shalt.err (!%p501_p10)
}
  0x19   :  { %s505_s6 = scalar_lea.vmem %s572_s15, 1024  ;;  %p510_p12 = scmp.lt.s32.totalorder %s572_s15, %s572_s15 }
  0x1a   :  { %p506_p11 = scmp.ne.s32.totalorder %s572_s15, %s505_s6  ;;  %p511_p13 = scmp.lt.s32.totalorder %s505_s6, %s505_s6 }
  0x1c   :  { %p512_p0 = por %p511_p13, %p510_p12 }
  0x1e   :  { %p513_p1 = pnand %p512_p0, %p506_p11 }
  0x20   :  { %516 = shalt.err (!%p513_p1)
}
  0x21   :  { %s547_s0 = smov 64   ;;  %s548_s7 = smov 4  }
  0x22   :  { %34 = dma.hbm_to_vmem [thread:$0]  %s668_s2, 1024, %s572_s15, [#allocation6], %s547_s0, %s547_s0, %s548_s7  }
  0x23   :  { %539 = dma.done.wait [#allocation3], 64  }
  0x24   :  { %540 = vsyncadd [#allocation3], 4294967232 }
  0x25   :  { %541 = dma.done.wait [#allocation6], 1024  }
  0x26   :  { %542 = vsyncadd [#allocation6], 4294966272  ;;  %v549_v0 = vmov 0.0   ;;  %vm550_vm0 = vmmov 0   ;;  %v461_v1 = vld [vmem:[#allocation5] sm:$0xff]   ;;  %v462_v2 = vld [vmem:[#allocation5 + $0x8] sm:$0xff]   ;;  %v292_v33 = vlaneseq }
  0x27   :  { %366 = vmatprep.subr.bf16.mxu0 %v549_v0  ;;  %406 = vmatprep.subr.bf16.mxu1 %v549_v0  ;;  %v463_v3 = vld [vmem:[#allocation5 + $0x10] sm:$0xff]   ;;  %v464_v4 = vld [vmem:[#allocation5 + $0x18] sm:$0xff]   ;;  %v465_v7 = vld [vmem:[#allocation5 + $0x20] sm:$0xff]   ;;  %s551_s11 = smov [#allocation7]  }
  0x28   :  { %382 = vmatprep.mubr.msk.bf16.mxu0 %vm550_vm0, %v549_v0  ;;  %422 = vmatprep.mubr.msk.bf16.mxu1 %vm550_vm0, %v549_v0  ;;  %v613_v5 = vld [vmem:[#allocation2] sm:$0xf]  ;;  %v466_v10 = vld [vmem:[#allocation5 + $0x28] sm:$0xff]   ;;  %v467_v13 = vld [vmem:[#allocation5 + $0x30] sm:$0xff]   ;;  %v293_v37 = vshrl.u32 %v292_v33, 7  ;;  %s312_s12 = sshll.u32 %s551_s11, 4  ;;  %s313_s12 = int_to_ptr.vmem [resolvable:$true] %s312_s12 }
  0x29   :  { %367 = vmatpush3.bf16.msra.mxu0 %v461_v1  ;;  %407 = vmatpush3.bf16.msra.mxu1 %v461_v1  ;;  %v192_v6 = vmul.f32 %v613_v5, %v613_v5  ;;  %v60_v8 = vpack.c.bf16 %v613_v5, %v613_v5  ;;  %v468_v16 = vld [vmem:[#allocation5 + $0x38] sm:$0xff]   ;;  %s517_s13 = scalar_lea.vmem %s313_s12, 64  ;;  %p522_p3 = scmp.lt.s32.totalorder %s313_s12, %s313_s12 }
  0x2a   :  { %368 = vmatprep.subr.bf16.mxu0 %v549_v0  ;;  %408 = vmatprep.subr.bf16.mxu1 %v549_v0  ;;  %v294_v40 = vsub.s32 0, %v293_v37  ;;  %v43_v41 = vld [vmem:[%s667_s1] sm:$0x3]  ;;  %v302_v44 = vsub.s32 1, %v293_v37  ;;  %p518_p2 = scmp.ne.s32.totalorder %s313_s12, %s517_s13  ;;  %p523_p4 = scmp.lt.s32.totalorder %s517_s13, %s517_s13 }
  0x2b   :  { %v193_v9 = vpack.c.bf16 %v192_v6, %v192_v6  ;;  %v61_v11 = vunpack.c.l.bf16 %v60_v8 }
  0x2c   :  { %v295_v43 = vrot.slane %v43_v41, %v294_v40  ;;  %v303_v46 = vrot.slane %v43_v41, %v302_v44  ;;  %p524_p5 = por %p523_p4, %p522_p3 }
  0x2d   :  { %369 = vmatpush3.bf16.msra.mxu0 %v462_v2  ;;  %409 = vmatpush3.bf16.msra.mxu1 %v462_v2  ;;  %v194_v12 = vunpack.c.l.bf16 %v193_v9  ;;  %v62_v14 = vsub.f32 %v613_v5, %v61_v11 }
  0x2e   :  { %370 = vmatprep.subr.bf16.mxu0 %v549_v0  ;;  %410 = vmatprep.subr.bf16.mxu1 %v549_v0  ;;  %p525_p6 = pnand %p524_p5, %p518_p2 }
  0x2f   :  { %v195_v15 = vsub.f32 %v192_v6, %v194_v12  ;;  %v63_v17 = vpack.c.bf16 %v62_v14, %v62_v14 }
  0x31   :  { %371 = vmatpush3.bf16.msra.mxu0 %v463_v3  ;;  %411 = vmatpush3.bf16.msra.mxu1 %v463_v3  ;;  %v196_v18 = vpack.c.bf16 %v195_v15, %v195_v15 }
  0x32   :  { %372 = vmatprep.subr.bf16.mxu0 %v549_v0  ;;  %412 = vmatprep.subr.bf16.mxu1 %v549_v0 }
  0x35   :  { %373 = vmatpush3.bf16.msra.mxu0 %v464_v4  ;;  %413 = vmatpush3.bf16.msra.mxu1 %v464_v4 }
  0x36   :  { %374 = vmatprep.subr.bf16.mxu0 %v549_v0  ;;  %414 = vmatprep.subr.bf16.mxu1 %v549_v0 }
  0x39   :  { %375 = vmatpush3.bf16.msra.mxu0 %v465_v7  ;;  %415 = vmatpush3.bf16.msra.mxu1 %v465_v7 }
  0x3a   :  { %376 = vmatprep.subr.bf16.mxu0 %v549_v0  ;;  %416 = vmatprep.subr.bf16.mxu1 %v549_v0 }
  0x3d   :  { %377 = vmatpush3.bf16.msra.mxu0 %v466_v10  ;;  %417 = vmatpush3.bf16.msra.mxu1 %v466_v10 }
  0x3e   :  { %378 = vmatprep.subr.bf16.mxu0 %v549_v0  ;;  %418 = vmatprep.subr.bf16.mxu1 %v549_v0 }
  0x41   :  { %379 = vmatpush3.bf16.msra.mxu0 %v467_v13  ;;  %419 = vmatpush3.bf16.msra.mxu1 %v467_v13 }
  0x42   :  { %380 = vmatprep.subr.bf16.mxu0 %v549_v0  ;;  %420 = vmatprep.subr.bf16.mxu1 %v549_v0 }
  0x45   :  { %381 = vmatpush3.bf16.msra.mxu0 %v468_v16  ;;  %421 = vmatpush3.bf16.msra.mxu1 %v468_v16 }
  0x46   :  { %386 = vmatprep.subr.bf16.mxu0 %v549_v0  ;;  %426 = vmatprep.subr.bf16.mxu1 %v549_v0 }
  0x48   :  { %383 = vmatmul.mubr.bf16.vlgmr.msra.gmra.mrb[0].mxu0 %v63_v17  ;;  %423 = vmatmul.mubr.bf16.vlgmr.msra.gmra.mrb[0].mxu1 %v196_v18 }
  0x49   :  { %387 = vmatpush3.bf16.msra.mxu0 %v461_v1  ;;  %427 = vmatpush3.bf16.msra.mxu1 %v461_v1 }
  0x4a   :  { %388 = vmatprep.subr.bf16.mxu0 %v549_v0  ;;  %428 = vmatprep.subr.bf16.mxu1 %v549_v0 }
  0x4b   :  { %402 = vmatprep.mubr.msk.bf16.mxu0 %vm550_vm0, %v549_v0  ;;  %442 = vmatprep.mubr.msk.bf16.mxu1 %vm550_vm0, %v549_v0 }
  0x4d   :  { %389 = vmatpush3.bf16.msra.mxu0 %v462_v2  ;;  %429 = vmatpush3.bf16.msra.mxu1 %v462_v2 }
  0x4e   :  { %390 = vmatprep.subr.bf16.mxu0 %v549_v0  ;;  %430 = vmatprep.subr.bf16.mxu1 %v549_v0 }
  0x51   :  { %391 = vmatpush3.bf16.msra.mxu0 %v463_v3  ;;  %431 = vmatpush3.bf16.msra.mxu1 %v463_v3 }
  0x52   :  { %392 = vmatprep.subr.bf16.mxu0 %v549_v0  ;;  %432 = vmatprep.subr.bf16.mxu1 %v549_v0 }
  0x55   :  { %393 = vmatpush3.bf16.msra.mxu0 %v464_v4  ;;  %433 = vmatpush3.bf16.msra.mxu1 %v464_v4 }
  0x56   :  { %394 = vmatprep.subr.bf16.mxu0 %v549_v0  ;;  %434 = vmatprep.subr.bf16.mxu1 %v549_v0 }
  0x59   :  { %395 = vmatpush3.bf16.msra.mxu0 %v465_v7  ;;  %435 = vmatpush3.bf16.msra.mxu1 %v465_v7 }
  0x5a   :  { %396 = vmatprep.subr.bf16.mxu0 %v549_v0  ;;  %436 = vmatprep.subr.bf16.mxu1 %v549_v0 }
  0x5d   :  { %397 = vmatpush3.bf16.msra.mxu0 %v466_v10  ;;  %437 = vmatpush3.bf16.msra.mxu1 %v466_v10 }
  0x5e   :  { %398 = vmatprep.subr.bf16.mxu0 %v549_v0  ;;  %438 = vmatprep.subr.bf16.mxu1 %v549_v0 }
  0x61   :  { %399 = vmatpush3.bf16.msra.mxu0 %v467_v13  ;;  %439 = vmatpush3.bf16.msra.mxu1 %v467_v13 }
  0x62   :  { %400 = vmatprep.subr.bf16.mxu0 %v549_v0  ;;  %440 = vmatprep.subr.bf16.mxu1 %v549_v0 }
  0x65   :  { %401 = vmatpush3.bf16.msra.mxu0 %v468_v16  ;;  %441 = vmatpush3.bf16.msra.mxu1 %v468_v16 }
  0x68   :  { %403 = vmatmul.mubr.bf16.vlgmr.msra.gmra.mrb[0].mxu0 %v60_v8  ;;  %443 = vmatmul.mubr.bf16.vlgmr.msra.gmra.mrb[0].mxu1 %v193_v9 }
 0x13b   :  { %v186_v19 = vpop.f32.mrb[0].mxu0  ;;  %v271_v20 = vpop.f32.mrb[0].mxu1 }
 0x13c   :  { %v278_v21 = vmul.f32 0.03125, %v186_v19  ;;  %v404_v22 = vpop.f32.mrb[1].mxu0  ;;  %v444_v23 = vpop.f32.mrb[1].mxu1 }
 0x13d   :  { %v189_v24 = vpop.f32.mrb[2].mxu0  ;;  %v274_v25 = vpop.f32.mrb[2].mxu1 }
 0x13e   :  { %v279_v26 = vmul.f32 %v278_v21, %v186_v19  ;;  %v405_v27 = vpop.f32.mrb[3].mxu0  ;;  %v445_v28 = vpop.f32.mrb[3].mxu1  ;;  %v291_v42 = vsub.f32 %v613_v5, %v278_v21 }
 0x140   :  { %v280_v29 = vsub.f32 %v271_v20, %v279_v26  ;;  %v296_v45 = vmul.f32 %v295_v43, %v291_v42 }
 0x142   :  { %v281_v30 = vmax.f32 %v280_v29, 0.0 }
 0x144   :  { %v283_v31 = vmul.f32 0.032258064, %v281_v30 }
 0x146   :  { %469 = vrsqrt.f32 %v283_v31  ;;  %vm286_vm1 = vcmp.eq.f32.partialorder %v283_v31, inf  ;;  %v289_v35 = vand.u32 2147483648, %v283_v31  ;;  %vm288_vm2 = vcmp.eq.f32.partialorder %v283_v31, 0.0 }
 0x150   :  { %v470_v32 = vpop.eup %469 }
 0x151   :  { %v285_v34 = vmul.f32 %v470_v32, %v283_v31 }
 0x153   :  { %v287_v36 = vsel %vm286_vm1, %v283_v31, %v285_v34 }
 0x154   :  { %v290_v38 = vsel %vm288_vm2, %v289_v35, %v287_v36 }
 0x155   :  { %v297_v39 = vadd.f32 1e-06, %v290_v38 }
 0x157   :  { %471 = vrcp.f32 %v297_v39 }
 0x161   :  { %v472_v47 = vpop.eup %471 }
 0x162   :  { %v299_v48 = vmul.f32 %v472_v47, %v296_v45 }
 0x164   :  { %v304_v49 = vadd.f32 %v303_v46, %v299_v48 }
 0x166   :  { %305 = vst [vmem:[#allocation7] sm:$0xf] %v304_v49 }
 0x167   :  { %528 = shalt.err (!%p525_p6)
}
 0x168   :  { %s529_s15 = scalar_lea.hbm %s669_s3, 64 }
 0x169   :  { %p530_p7 = scmp.ne.s32.totalorder %s669_s3, %s529_s15  ;;  %p533_p8 = scmp.lt.u32.totalorder %s529_s15, %s669_s3 }
 0x16b   :  { %p535_p9 = pnand %p533_p8, %p530_p7 }
 0x16d   :  { %538 = shalt.err (!%p535_p9)
}
 0x16e   :  { %315 = dma.vmem_to_hbm [thread:$0]  %s313_s12, 64, %s669_s3, [#allocation4]  }
 0x16f   :  { %543 = dma.done.wait [#allocation4], 64  }
 0x170   :  { %544 = vsyncadd [#allocation4], 4294967232 }
 0x171   :  { %319 = vsyncpa [#allocation3], 1 }
 0x172   :  { %320 = vsyncpa [#allocation6], 1 }
 0x173   :  { %321 = vsyncpa [#allocation4], 1 }

</bundles_post_ra>
